<compile_context>
chip_gen: v7x
topology: tpu7x:2x2x1
jax: 0.10.0
libtpu: 0.0.40
codegen_flags: <defaults>
</compile_context>

<pallas_src>
import functools

import jax
import jax.numpy as jnp
from jax.experimental import pallas as pl
from jax.experimental.pallas import tpu as pltpu


def _temporal_encoder_kernel(wy_ref, wd_ref, sm_ref, cm_ref, py_ref, pd_ref,
                             out_ref, *, tpf: int):
    # wy_ref/wd_ref : (1, D)  masked omegas (year lanes / day lanes)
    # sm_ref/cm_ref : (1, D)  sin / cos lane selectors with `scale` folded in
    # py_ref/pd_ref : (TM, 1) year / day-of-year columns
    # out_ref       : (TM, tpf*D) lane-dense output row-slab
    ang = py_ref[...] * wy_ref[...] + pd_ref[...] * wd_ref[...]        # (TM, D)
    emb = jnp.sin(ang) * sm_ref[...] + jnp.cos(ang) * cm_ref[...]      # (TM, D)
    if tpf > 1:
        # repeat_interleave over frames == tiling the per-frame row along lanes
        emb = jnp.concatenate([emb] * tpf, axis=1)                      # (TM, tpf*D)
    out_ref[...] = emb


def _make_omega(half_embed_dim: int) -> jnp.ndarray:
    # omega = 1 / 10000 ** (arange(half//2) / (half/2)), shape (1, half//2)
    k = half_embed_dim // 2
    omega = jnp.arange(k, dtype=jnp.float32) / (half_embed_dim / 2.0)
    omega = 1.0 / (10000.0 ** omega)
    return omega.reshape(1, k)


def temporal_encoder_forward(temporal_coords: jnp.ndarray,
                             embed_dim: int,
                             scale: jnp.ndarray,
                             tokens_per_frame: int | None = None) -> jnp.ndarray:
    """temporal_coords: (B, T, 2) float. Returns (B, T, embed_dim) or
    (B, T*tokens_per_frame, embed_dim)."""
    assert embed_dim % 2 == 0
    B, T, _ = temporal_coords.shape
    year_embed_dim = embed_dim // 2
    julian_day_embed_dim = embed_dim - year_embed_dim
    assert year_embed_dim % 2 == 0 and julian_day_embed_dim % 2 == 0
    Hy = year_embed_dim // 2
    Hd = julian_day_embed_dim // 2
    D = embed_dim
    tpf = 1 if tokens_per_frame is None else int(tokens_per_frame)
    W = tpf * D

    coords = temporal_coords.astype(jnp.float32)
    M = B * T
    pos_year = coords[:, :, 0].reshape(M, 1)
    pos_day = coords[:, :, 1].reshape(M, 1)

    # Row tiling: biggest tile up to 512 rows (keeps double-buffered lane-dense
    # output tiles within the default scoped-VMEM budget on all generations).
    if M >= 512:
        tm = 512
    else:
        tm = ((M + 7) // 8) * 8
    m_pad = ((M + tm - 1) // tm) * tm
    if m_pad != M:
        pad = ((0, m_pad - M), (0, 0))
        pos_year = jnp.pad(pos_year, pad)
        pos_day = jnp.pad(pos_day, pad)
    grid_rows = m_pad // tm

    # Host-side (trace-time) constants: full-width masked omegas + selectors.
    omega_y = _make_omega(year_embed_dim)                    # (1, Hy)
    omega_d = _make_omega(julian_day_embed_dim)              # (1, Hd)
    zy = jnp.zeros((1, Hy), jnp.float32)
    zd = jnp.zeros((1, Hd), jnp.float32)
    oy = jnp.ones((1, Hy), jnp.float32)
    od = jnp.ones((1, Hd), jnp.float32)
    # output lane order: [sin(year) | cos(year) | sin(day) | cos(day)]
    wy_full = jnp.concatenate([omega_y, omega_y, zd, zd], axis=1)       # (1, D)
    wd_full = jnp.concatenate([zy, zy, omega_d, omega_d], axis=1)       # (1, D)
    s = scale.reshape(()).astype(jnp.float32)
    sin_sel = jnp.concatenate([oy, zy, od, zd], axis=1) * s             # (1, D)
    cos_sel = jnp.concatenate([zy, oy, zd, od], axis=1) * s             # (1, D)

    out = pl.pallas_call(
        functools.partial(_temporal_encoder_kernel, tpf=tpf),
        out_shape=jax.ShapeDtypeStruct((m_pad, W), jnp.float32),
        grid=(grid_rows,),
        in_specs=[
            pl.BlockSpec((1, D), lambda i: (0, 0)),
            pl.BlockSpec((1, D), lambda i: (0, 0)),
            pl.BlockSpec((1, D), lambda i: (0, 0)),
            pl.BlockSpec((1, D), lambda i: (0, 0)),
            pl.BlockSpec((tm, 1), lambda i: (i, 0)),
            pl.BlockSpec((tm, 1), lambda i: (i, 0)),
        ],
        out_specs=pl.BlockSpec((tm, W), lambda i: (i, 0)),
        compiler_params=pltpu.CompilerParams(
            dimension_semantics=("parallel",)),
    )(wy_full, wd_full, sin_sel, cos_sel, pos_year, pos_day)

    # (M, tpf*D) row-major == (B, T*tpf, D) row-major (repeat is per-frame
    # contiguous), so this reshape is pure metadata.
    embedding = out[:M].reshape(B, T * tpf, D)
    return embedding


def _reference_forward(temporal_coords, embed_dim, scale, tokens_per_frame=None):
    """Pure-JAX reference mirroring the PyTorch module."""
    B, T, _ = temporal_coords.shape
    year_embed_dim = embed_dim // 2
    julian_day_embed_dim = embed_dim - year_embed_dim

    def sincos(half, pos):
        omega = jnp.arange(half // 2, dtype=pos.dtype) / (half / 2.0)
        omega = 1.0 / (10000.0 ** omega)
        out = jnp.einsum('m,d->md', pos, omega)
        return jnp.concatenate([jnp.sin(out), jnp.cos(out)], axis=1)

    year = sincos(year_embed_dim, temporal_coords[:, :, 0].reshape(-1)).reshape(B, T, -1)
    day = sincos(julian_day_embed_dim, temporal_coords[:, :, 1].reshape(-1)).reshape(B, T, -1)
    embedding = scale * jnp.concatenate([year, day], axis=-1)
    if tokens_per_frame is not None:
        embedding = jnp.repeat(embedding, tokens_per_frame, axis=1)
    return embedding


if __name__ == "__main__":
    B, T, embed_dim = 2, 8, 32
    tokens_per_frame = 4

    key = jax.random.PRNGKey(0)
    k_year, k_day = jax.random.split(key)
    years = jax.random.uniform(k_year, (B, T), jnp.float32, minval=2015.0, maxval=2024.0)
    days = jax.random.uniform(k_day, (B, T), jnp.float32, minval=0.0, maxval=365.0)
    temporal_coords = jnp.stack([years, days], axis=-1)  # (B, T, 2)

    # trainable_scale=False -> buffer of ones(1) (deterministic init)
    scale = jnp.ones((1,), dtype=jnp.float32)

    # Fused repeat_interleave path.
    out = temporal_encoder_forward(temporal_coords, embed_dim, scale,
                                   tokens_per_frame=tokens_per_frame)
    out = jax.block_until_ready(out)
    ref = _reference_forward(temporal_coords, embed_dim, scale,
                             tokens_per_frame=tokens_per_frame)
    assert out.shape == (B, T * tokens_per_frame, embed_dim), out.shape
    assert jnp.allclose(out, ref, atol=1e-5, rtol=1e-5), "mismatch vs reference (tpf)"

    # No-repeat path.
    out2 = jax.block_until_ready(
        temporal_encoder_forward(temporal_coords, embed_dim, scale))
    ref2 = _reference_forward(temporal_coords, embed_dim, scale)
    assert out2.shape == (B, T, embed_dim), out2.shape
    assert jnp.allclose(out2, ref2, atol=1e-5, rtol=1e-5), "mismatch vs reference"

    print("KERNEL_OK")
</pallas_src>

<mosaic_0001>
module attributes {stable_mosaic.version = 11 : i64} {
  func.func @_temporal_encoder_kernel(%arg0: i32, %arg1: memref<1x32xf32, #tpu.memory_space<vmem>>, %arg2: memref<1x32xf32, #tpu.memory_space<vmem>>, %arg3: memref<1x32xf32, #tpu.memory_space<vmem>>, %arg4: memref<1x32xf32, #tpu.memory_space<vmem>>, %arg5: memref<16x1xf32, #tpu.memory_space<vmem>>, %arg6: memref<16x1xf32, #tpu.memory_space<vmem>>, %arg7: memref<16x128xf32, #tpu.memory_space<vmem>>) attributes {dimension_semantics = [#tpu.dimension_semantics<parallel>], iteration_bounds = array<i64: 1>, scalar_prefetch = 0 : i64, scratch_operands = 0 : i64, tpu.core_type = #tpu.core_type<tc>, window_params = [{pipeline_mode = #tpu.pipeline_mode<synchronous>, transform_indices = @transform_0, window_bounds = array<i64: 1, 32>}, {pipeline_mode = #tpu.pipeline_mode<synchronous>, transform_indices = @transform_1, window_bounds = array<i64: 1, 32>}, {pipeline_mode = #tpu.pipeline_mode<synchronous>, transform_indices = @transform_2, window_bounds = array<i64: 1, 32>}, {pipeline_mode = #tpu.pipeline_mode<synchronous>, transform_indices = @transform_3, window_bounds = array<i64: 1, 32>}, {transform_indices = @transform_4, window_bounds = array<i64: 16, 1>}, {transform_indices = @transform_5, window_bounds = array<i64: 16, 1>}, {transform_indices = @transform_6, window_bounds = array<i64: 16, 128>}]} {
    %c0 = arith.constant 0 : index
    %c0_0 = arith.constant 0 : index
    %0 = vector.load %arg5[%c0, %c0_0] : memref<16x1xf32, #tpu.memory_space<vmem>>, vector<16x1xf32>
    %c0_1 = arith.constant 0 : index
    %c0_2 = arith.constant 0 : index
    %1 = vector.load %arg1[%c0_1, %c0_2] : memref<1x32xf32, #tpu.memory_space<vmem>>, vector<1x32xf32>
    %2 = vector.broadcast %0 : vector<16x1xf32> to vector<16x32xf32>
    %3 = vector.broadcast %1 : vector<1x32xf32> to vector<16x32xf32>
    %4 = arith.mulf %2, %3 : vector<16x32xf32>
    %c0_3 = arith.constant 0 : index
    %c0_4 = arith.constant 0 : index
    %5 = vector.load %arg6[%c0_3, %c0_4] : memref<16x1xf32, #tpu.memory_space<vmem>>, vector<16x1xf32>
    %c0_5 = arith.constant 0 : index
    %c0_6 = arith.constant 0 : index
    %6 = vector.load %arg2[%c0_5, %c0_6] : memref<1x32xf32, #tpu.memory_space<vmem>>, vector<1x32xf32>
    %7 = vector.broadcast %5 : vector<16x1xf32> to vector<16x32xf32>
    %8 = vector.broadcast %6 : vector<1x32xf32> to vector<16x32xf32>
    %9 = arith.mulf %7, %8 : vector<16x32xf32>
    %10 = arith.addf %4, %9 : vector<16x32xf32>
    %11 = math.sin %10 : vector<16x32xf32>
    %c0_7 = arith.constant 0 : index
    %c0_8 = arith.constant 0 : index
    %12 = vector.load %arg3[%c0_7, %c0_8] : memref<1x32xf32, #tpu.memory_space<vmem>>, vector<1x32xf32>
    %13 = vector.broadcast %12 : vector<1x32xf32> to vector<16x32xf32>
    %14 = arith.mulf %11, %13 : vector<16x32xf32>
    %15 = math.cos %10 : vector<16x32xf32>
    %c0_9 = arith.constant 0 : index
    %c0_10 = arith.constant 0 : index
    %16 = vector.load %arg4[%c0_9, %c0_10] : memref<1x32xf32, #tpu.memory_space<vmem>>, vector<1x32xf32>
    %17 = vector.broadcast %16 : vector<1x32xf32> to vector<16x32xf32>
    %18 = arith.mulf %15, %17 : vector<16x32xf32>
    %19 = arith.addf %14, %18 : vector<16x32xf32>
    %20 = tpu.concatenate %19, %19, %19, %19 in 1 : vector<16x32xf32>, vector<16x32xf32>, vector<16x32xf32>, vector<16x32xf32> -> vector<16x128xf32>
    %c0_11 = arith.constant 0 : index
    %c0_12 = arith.constant 0 : index
    %21 = vector.load %arg7[%c0_11, %c0_12] : memref<16x128xf32, #tpu.memory_space<vmem>>, vector<16x128xf32>
    tpu.vector_store %arg7[%c0_11, %c0_12], %20 {strides = array<i32>} : memref<16x128xf32, #tpu.memory_space<vmem>>, vector<16x128xf32>,
    return
  }
  func.func @transform_0(%arg0: i32) -> (i32, i32) {
    %c0_i32 = arith.constant 0 : i32
    %c0_i32_0 = arith.constant 0 : i32
    %c0_i32_1 = arith.constant 0 : i32
    return %c0_i32, %c0_i32_0 : i32, i32
  }
  func.func @transform_1(%arg0: i32) -> (i32, i32) {
    %c0_i32 = arith.constant 0 : i32
    %c0_i32_0 = arith.constant 0 : i32
    %c0_i32_1 = arith.constant 0 : i32
    return %c0_i32, %c0_i32_0 : i32, i32
  }
  func.func @transform_2(%arg0: i32) -> (i32, i32) {
    %c0_i32 = arith.constant 0 : i32
    %c0_i32_0 = arith.constant 0 : i32
    %c0_i32_1 = arith.constant 0 : i32
    return %c0_i32, %c0_i32_0 : i32, i32
  }
  func.func @transform_3(%arg0: i32) -> (i32, i32) {
    %c0_i32 = arith.constant 0 : i32
    %c0_i32_0 = arith.constant 0 : i32
    %c0_i32_1 = arith.constant 0 : i32
    return %c0_i32, %c0_i32_0 : i32, i32
  }
  func.func @transform_4(%arg0: i32) -> (i32, i32) {
    %c0_i32 = arith.constant 0 : i32
    %c0_i32_0 = arith.constant 0 : i32
    return %arg0, %c0_i32 : i32, i32
  }
  func.func @transform_5(%arg0: i32) -> (i32, i32) {
    %c0_i32 = arith.constant 0 : i32
    %c0_i32_0 = arith.constant 0 : i32
    return %arg0, %c0_i32 : i32, i32
  }
  func.func @transform_6(%arg0: i32) -> (i32, i32) {
    %c0_i32 = arith.constant 0 : i32
    %c0_i32_0 = arith.constant 0 : i32
    return %arg0, %c0_i32 : i32, i32
  }
}

</mosaic_0001>

<bundles_post_ra>
// kernel: tpu_custom_call.1
= control target key start
LH: loop header
LB: loop body
LE: loop exit
PB: predicated region body
PF: predicated region fallthrough
CT: control target
= control target key end

     0   :  { %v624_v2 = vmov 0   ;;  %s768_s0 = inlined_call_operand.vmem [shape: f32[1,32], index: 0, kind: input, shape index: {}]   ;;  %s769_s1 = inlined_call_operand.vmem [shape: f32[1,32], index: 1, kind: input, shape index: {}]   ;;  %s770_s2 = inlined_call_operand.vmem [shape: f32[1,32], index: 2, kind: input, shape index: {}]   ;;  %s771_s3 = inlined_call_operand.vmem [shape: f32[1,32], index: 3, kind: input, shape index: {}]   ;;  %s772_s4 = inlined_call_operand.vmem [shape: f32[16,1], index: 4, kind: input, shape index: {}]   ;;  %s773_s5 = inlined_call_operand.vmem [shape: f32[16,1], index: 5, kind: input, shape index: {}]   ;;  %s774_s6 = inlined_call_operand.hbm [shape: f32[16,128], index: 6, kind: output, shape index: {}]  }
   0x1   :  { %v45_v0 = vld [vmem:[%s773_s5] sm:$0xff]  ;;  %591 = vset.pattern.permute.xlu1 %v624_v2  ;;  %590 = vset.pattern.permute.xlu0 %v624_v2  ;;  %v46_v3 = vld [vmem:[%s773_s5 + $0x8] sm:$0xff] }
   0x2   :  { %v24_v1 = vld [vmem:[%s772_s4] sm:$0xff]  ;;  %50 = vperm.xlu1 %591, %v45_v0   ;;  %v25_v4 = vld [vmem:[%s772_s4 + $0x8] sm:$0xff] }
   0x3   :  { %29 = vperm.xlu0 %590, %v24_v1  }
   0x4   :  { %11 = vsyncpa [#allocation3], 0  ;;  %v550_v5 = vld [vmem:[%s769_s1] ss:$0 sm:$0xff]  ;;  %v625_v33 = vmov 683565275  }
   0x5   :  { %v549_v6 = vld [vmem:[%s768_s0] ss:$0 sm:$0xff]  ;;  %v626_v37 = vmov 2475754826   ;;  %v627_v39 = vmov 2131351028  }
   0x6   :  { %55 = vperm.xlu1 %591, %v46_v3   ;;  %v628_v41 = vmov 2102212464   ;;  %v629_v43 = vmov 920167782   ;;  %v630_v50 = vmov 1326507024  }
   0x7   :  { %34 = vperm.xlu0 %590, %v25_v4   ;;  %s633_s9 = smov 96   ;;  %s634_s10 = smov [#allocation2]  }
   0x8   :  { %s538_s11 = sshll.u32 %s634_s10, 4  ;;  %s539_s11 = int_to_ptr.vmem [resolvable:$true] %s538_s11 }
   0x9   :  { %s600_s12 = scalar_lea.vmem %s539_s11, 256  ;;  %p605_p1 = scmp.lt.s32.totalorder %s539_s11, %s539_s11 }
   0xa   :  { %p601_p0 = scmp.ne.s32.totalorder %s539_s11, %s600_s12  ;;  %p606_p2 = scmp.lt.s32.totalorder %s600_s12, %s600_s12 }
   0xc   :  { %p607_p3 = por %p606_p2, %p605_p1 }
   0xe   :  { %p608_p4 = pnand %p607_p3, %p601_p0 }
  0x81   :  { %v51_v7 = vpop.permute.xlu1 %50 }
  0x82   :  { %v30_v8 = vpop.permute.xlu0 %29  ;;  %v64_v9 = vmul.f32 %v550_v5, %v51_v7 }
  0x83   :  { %v43_v10 = vmul.f32 %v549_v6, %v30_v8 }
  0x85   :  { %v690_v11 = vadd.f32 %v64_v9, %v43_v10  ;;  %v56_v12 = vpop.permute.xlu1 %55 }
  0x86   :  { %v35_v13 = vpop.permute.xlu0 %34  ;;  %v65_v16 = vmul.f32 %v550_v5, %v56_v12 }
  0x87   :  { %v68_v14 = vand.u32 2147483647, %v690_v11  ;;  %v71_v15 = vand.u32 2139095040, %v690_v11  ;;  %v44_v17 = vmul.f32 %v549_v6, %v35_v13  ;;  %vm70_vm14 = vcmp.lt.s32.totalorder %v690_v11, 0 }
  0x89   :  { %v72_v18 = vshrl.u32 %v71_v15, 23  ;;  %v75_v19 = vand.u32 8388607, %v68_v14  ;;  %v696_v20 = vadd.f32 %v65_v16, %v44_v17  ;;  %vm69_vm15 = vcmp.le.f32.partialorder %v68_v14, 0.7853982 }
  0x8b   :  { %v551_v21 = vadd.s32 4294967169, %v72_v18  ;;  %v175_v22 = vand.u32 2139095040, %v696_v20  ;;  %v76_v24 = vor.u32 8388608, %v75_v19  ;;  %v172_v26 = vand.u32 2147483647, %v696_v20 }
  0x8d   :  { %v78_v23 = vadd.s32 1, %v551_v21  ;;  %v176_v25 = vshrl.u32 %v175_v22, 23  ;;  %v700_v31 = vshll.u32 %v76_v24, 8  ;;  %v179_v35 = vand.u32 8388607, %v172_v26 }
  0x8f   :  { %vm79_vm0 = vcmp.gt.s32.totalorder %v78_v23, 0  ;;  %v555_v28 = vadd.s32 4294967169, %v176_v25  ;;  %v180_v1 = vor.u32 8388608, %v179_v35 }
  0x90   :  { %v80_v27 = vsel %vm79_vm0, %v78_v23, 0  ;;  %vm174_vm0 = vcmp.lt.s32.totalorder %v696_v20, 0 }
  0x91   :  { %v81_v29 = vshrl.u32 %v80_v27, 5  ;;  %v82_v30 = vand.u32 31, %v80_v27  ;;  %v182_v36 = vadd.s32 1, %v555_v28  ;;  %v220_v16 = vshll.u32 %v180_v1, 8 }
  0x93   :  { %v83_v32 = vsub.s32 32, %v82_v30  ;;  %v85_v34 = vshll.u32 %v625_v33, %v82_v30  ;;  %v88_v38 = vshll.u32 %v626_v37, %v82_v30  ;;  %v91_v40 = vshll.u32 %v627_v39, %v82_v30 }
  0x94   :  { %v94_v42 = vshll.u32 %v628_v41, %v82_v30  ;;  %v97_v44 = vshll.u32 %v629_v43, %v82_v30  ;;  %vm100_vm1 = vcmp.lt.s32.totalorder %v81_v29, 1  ;;  %vm102_vm2 = vcmp.lt.s32.totalorder %v81_v29, 3 }
  0x95   :  { %v86_v45 = vshrl.u32 %v626_v37, %v83_v32  ;;  %v89_v46 = vshrl.u32 %v627_v39, %v83_v32  ;;  %v92_v47 = vshrl.u32 %v628_v41, %v83_v32  ;;  %v84_v48 = vshrl.u32 %v625_v33, %v83_v32 }
  0x96   :  { %v95_v49 = vshrl.u32 %v629_v43, %v83_v32  ;;  %v98_v51 = vshrl.u32 %v630_v50, %v83_v32  ;;  %vm183_vm3 = vcmp.gt.s32.totalorder %v182_v36, 0  ;;  %vm103_vm4 = vcmp.lt.s32.totalorder %v81_v29, 4 }
  0x97   :  { %v87_v52 = vor.u32 %v86_v45, %v85_v34  ;;  %v90_v53 = vor.u32 %v89_v46, %v88_v38  ;;  %v93_v54 = vor.u32 %v92_v47, %v91_v40  ;;  %v184_v57 = vsel %vm183_vm3, %v182_v36, 0 }
  0x98   :  { %v96_v55 = vor.u32 %v95_v49, %v94_v42  ;;  %v99_v56 = vor.u32 %v98_v51, %v97_v44  ;;  %vm101_vm5 = vcmp.lt.s32.totalorder %v81_v29, 2  ;;  %v186_v4 = vand.u32 31, %v184_v57 }
  0x99   :  { %v104_v58 = vsel %vm100_vm1, %v84_v48, %v87_v52  ;;  %v105_v59 = vsel %vm103_vm4, %v93_v54, 2102212464  ;;  %v108_v60 = vsel %vm100_vm1, %v87_v52, %v90_v53  ;;  %v112_v61 = vsel %vm100_vm1, %v90_v53, %v93_v54 }
  0x9a   :  { %v106_v62 = vsel %vm102_vm2, %v90_v53, %v105_v59  ;;  %v109_v63 = vsel %vm103_vm4, %v96_v55, 920167782  ;;  %v113_v0 = vsel %vm103_vm4, %v99_v56, 1326507024  ;;  %v185_v13 = vshrl.u32 %v184_v57, 5 }
  0x9b   :  { %v110_v2 = vsel %vm102_vm2, %v93_v54, %v109_v63  ;;  %v114_v3 = vsel %vm102_vm2, %v96_v55, %v113_v0  ;;  %v107_v5 = vsel %vm101_vm5, %v104_v58, %v106_v62  ;;  %v187_v15 = vsub.s32 32, %v186_v4 }
  0x9c   :  { %v111_v6 = vsel %vm101_vm5, %v108_v60, %v110_v2  ;;  %v115_v7 = vsel %vm101_vm5, %v112_v61, %v114_v3  ;;  %v123_v17 = vmul.u32 %v700_v31, %v107_v5  ;;  %v189_v18 = vshll.u32 %v625_v33, %v186_v4 }
  0x9d   :  { %v713_v8 = vmul.u32.u64.low %v700_v31, %v115_v7  ;;  %v714_v9 = vmul.u32.u64.high %v700_v31, %v115_v7, %v713_v8  ;;  %v717_v10 = vmul.u32.u64.low %v700_v31, %v111_v6  ;;  %v718_v12 = vmul.u32.u64.high %v700_v31, %v111_v6, %v717_v10 }
  0x9e   :  { %v192_v19 = vshll.u32 %v626_v37, %v186_v4  ;;  %v195_v21 = vshll.u32 %v627_v39, %v186_v4  ;;  %v190_v22 = vshrl.u32 %v626_v37, %v187_v15  ;;  %v193_v23 = vshrl.u32 %v627_v39, %v187_v15 }
  0x9f   :  { %v196_v24 = vshrl.u32 %v628_v41, %v187_v15  ;;  %v198_v25 = vshll.u32 %v628_v41, %v186_v4  ;;  %vm125_vm6 = vc.u32 %v714_v9, %v717_v10  ;;  %v126_v27 = vadd.s32 1, %v718_v12 }
  0xa0   :  { %v199_v28 = vshrl.u32 %v629_v43, %v187_v15  ;;  %v201_v29 = vshll.u32 %v629_v43, %v186_v4  ;;  %v191_v30 = vor.u32 %v190_v22, %v189_v18  ;;  %v194_v32 = vor.u32 %v193_v23, %v192_v19 }
  0xa1   :  { %v197_v34 = vor.u32 %v196_v24, %v195_v21  ;;  %v202_v35 = vshrl.u32 %v630_v50, %v187_v15  ;;  %v127_v31 = vsel %vm125_vm6, %v126_v27, %v718_v12  ;;  %vm204_vm7 = vcmp.lt.s32.totalorder %v185_v13, 1 }
  0xa2   :  { %v200_v36 = vor.u32 %v199_v28, %v198_v25  ;;  %vm207_vm8 = vcmp.lt.s32.totalorder %v185_v13, 4  ;;  %v128_v37 = vadd.s32 %v127_v31, %v123_v17  ;;  %vm206_vm9 = vcmp.lt.s32.totalorder %v185_v13, 3 }
  0xa3   :  { %v203_v38 = vor.u32 %v202_v35, %v201_v29  ;;  %v209_v39 = vsel %vm207_vm8, %v197_v34, 2102212464  ;;  %v188_v40 = vshrl.u32 %v625_v33, %v187_v15  ;;  %v212_v41 = vsel %vm204_vm7, %v191_v30, %v194_v32 }
  0xa4   :  { %v213_v42 = vsel %vm207_vm8, %v200_v36, 920167782  ;;  %v216_v44 = vsel %vm204_vm7, %v194_v32, %v197_v34  ;;  %v129_v45 = vadd.s32 536870912, %v128_v37  ;;  %vm205_vm10 = vcmp.lt.s32.totalorder %v185_v13, 2 }
  0xa5   :  { %v214_v43 = vsel %vm206_vm9, %v197_v34, %v213_v42  ;;  %v217_v46 = vsel %vm207_vm8, %v203_v38, 1326507024  ;;  %v208_v47 = vsel %vm204_vm7, %v188_v40, %v191_v30  ;;  %v210_v48 = vsel %vm206_vm9, %v194_v32, %v209_v39 }
  0xa6   :  { %v215_v49 = vsel %vm205_vm10, %v212_v41, %v214_v43  ;;  %v218_v50 = vsel %vm206_vm9, %v200_v36, %v217_v46  ;;  %v130_v51 = vshrl.u32 %v129_v45, 30  ;;  %v211_v57 = vsel %vm205_vm10, %v208_v47, %v210_v48 }
  0xa7   :  { %v219_v52 = vsel %vm205_vm10, %v216_v44, %v218_v50  ;;  %v728_v53 = vmul.u32.u64.low %v220_v16, %v215_v49  ;;  %v729_v54 = vmul.u32.u64.high %v220_v16, %v215_v49, %v728_v53  ;;  %v227_v60 = vmul.u32 %v220_v16, %v211_v57 }
  0xa8   :  { %v731_v55 = vmul.u32.u64.low %v220_v16, %v219_v52  ;;  %v732_v56 = vmul.u32.u64.high %v220_v16, %v219_v52, %v731_v55  ;;  %v131_v33 = vshll.u32 %v130_v51, 30  ;;  %v124_v8 = vadd.s32 %v717_v10, %v714_v9 }
  0xa9   :  { %v230_v59 = vadd.s32 1, %v729_v54  ;;  %v154_v30 = vsub.s32 4, %v130_v51  ;;  %vm173_vm1 = vcmp.le.f32.partialorder %v172_v26, 0.7853982  ;;  %v559_v26 = vld [vmem:[%s770_s2] ss:$0 sm:$0xff]  ;;  %vm160_vm8 = vweird.f32 %v690_v11 }
  0xaa   :  { %v132_v58 = vsub.s32 %v128_v37, %v131_v33  ;;  %vm229_vm11 = vc.u32 %v732_v56, %v728_v53  ;;  %v228_v9 = vadd.s32 %v728_v53, %v732_v56  ;;  %s631_s2 = smov 32  }
  0xab   :  { %v231_v62 = vsel %vm229_vm11, %v230_v59, %v729_v54  ;;  %v155_v39 = vsel %vm70_vm14, %v154_v30, %v130_v51 }
  0xac   :  { %v134_v61 = vsub.s32 0, %v132_v58  ;;  %v232_v63 = vadd.s32 %v231_v62, %v227_v60  ;;  %v157_v44 = vsel %vm69_vm15, 0, %v155_v39 }
  0xad   :  { %v161_v47 = vadd.s32 3, %v157_v44  ;;  %v378_v52 = vand.u32 3, %v157_v44 }
  0xae   :  { %v552_v0 = vmin.u32 %v134_v61, %v132_v58  ;;  %v233_v1 = vadd.s32 536870912, %v232_v63 }
  0xaf   :  { %v162_v14 = vand.u32 3, %v161_v47  ;;  %vm383_vm2 = vcmp.eq.s32.totalorder %v378_v52, 2  ;;  %vm380_vm5 = vcmp.eq.s32.totalorder %v378_v52, 0  ;;  %vm379_vm7 = vcmp.lt.s32.totalorder %v378_v52, 2 }
  0xb0   :  { %v136_v2 = vclz %v552_v0  ;;  %v234_v3 = vshrl.u32 %v233_v1, 30 }
  0xb1   :  { %vm167_vm3 = vcmp.eq.s32.totalorder %v162_v14, 2  ;;  %vm164_vm4 = vcmp.eq.s32.totalorder %v162_v14, 0  ;;  %vm163_vm6 = vcmp.lt.s32.totalorder %v162_v14, 2 }
  0xb2   :  { %v553_v4 = vadd.s32 4294967294, %v136_v2  ;;  %v235_v5 = vshll.u32 %v234_v3, 30  ;;  %v258_v49 = vsub.s32 4, %v234_v3 }
  0xb4   :  { %vm554_vm12 = vcmp.lt.s32.totalorder %v553_v4, 0  ;;  %v236_v7 = vsub.s32 %v232_v63, %v235_v5  ;;  %v259_v53 = vsel %vm174_vm0, %v258_v49, %v234_v3  ;;  %v568_v63 = vld [vmem:[%s771_s3] ss:$0 sm:$0xff]  ;;  %s632_s3 = smov 64  }
  0xb5   :  { %v139_v6 = vsel %vm554_vm12, 0, %v553_v4  ;;  %v261_v57 = vsel %vm173_vm1, 0, %v259_v53 }
  0xb6   :  { %v140_v12 = vsub.s32 32, %v139_v6  ;;  %v144_v13 = vsub.s32 4294967266, %v139_v6  ;;  %v238_v15 = vsub.s32 0, %v236_v7  ;;  %v141_v16 = vshll.u32 %v132_v58, %v139_v6 }
  0xb7   :  { %v265_v2 = vadd.s32 3, %v261_v57 }
  0xb8   :  { %v142_v17 = vshrl.u32 %v124_v8, %v140_v12  ;;  %v145_v18 = vadd.s32 127, %v144_v13  ;;  %v556_v19 = vmin.u32 %v238_v15, %v236_v7  ;;  %v481_v12 = vand.u32 3, %v261_v57 }
  0xb9   :  { %v266_v8 = vand.u32 3, %v265_v2 }
  0xba   :  { %v143_v21 = vor.u32 %v142_v17, %v141_v16  ;;  %v146_v22 = vshll.u32 %v145_v18, 23  ;;  %v240_v23 = vclz %v556_v19  ;;  %vm486_vm10 = vcmp.eq.s32.totalorder %v481_v12, 2 }
  0xbb   :  { %vm271_vm9 = vcmp.eq.s32.totalorder %v266_v8, 2  ;;  %vm268_vm11 = vcmp.eq.s32.totalorder %v266_v8, 0  ;;  %vm483_vm12 = vcmp.eq.s32.totalorder %v481_v12, 0 }
  0xbc   :  { %v147_v24 = vor.u32 4788187, %v146_v22  ;;  %v557_v25 = vadd.s32 4294967294, %v240_v23  ;;  %v150_v28 = vcvt.s32.f32 %v143_v21 }
  0xbe   :  { %v148_v27 = vand.u32 2147483647, %v147_v24  ;;  %vm558_vm13 = vcmp.lt.s32.totalorder %v557_v25, 0 }
  0xbf   :  { %v243_v32 = vsel %vm558_vm13, 0, %v557_v25  ;;  %vm267_vm13 = vcmp.lt.s32.totalorder %v266_v8, 2 }
  0xc0   :  { %v151_v29 = vmul.f32 %v150_v28, %v148_v27  ;;  %v244_v10 = vsub.s32 32, %v243_v32  ;;  %v248_v34 = vsub.s32 4294967266, %v243_v32  ;;  %v245_v31 = vshll.u32 %v236_v7, %v243_v32 }
  0xc2   :  { %v152_v35 = vxor.u32 2147483648, %v151_v29  ;;  %v246_v36 = vshrl.u32 %v228_v9, %v244_v10  ;;  %v249_v37 = vadd.s32 127, %v248_v34 }
  0xc4   :  { %v153_v38 = vsel %vm70_vm14, %v152_v35, %v151_v29  ;;  %v247_v41 = vor.u32 %v246_v36, %v245_v31  ;;  %v250_v42 = vshll.u32 %v249_v37, 23  ;;  %vm482_vm14 = vcmp.lt.s32.totalorder %v481_v12, 2 }
  0xc5   :  { %v156_v40 = vsel %vm69_vm15, %v690_v11, %v153_v38  ;;  %vm264_vm15 = vweird.f32 %v696_v20 }
  0xc6   :  { %592 = vcosq.f32 %v156_v40  ;;  %v251_v45 = vor.u32 4788187, %v250_v42  ;;  %v254_v46 = vcvt.s32.f32 %v247_v41 }
  0xc7   :  { %594 = vsinq.f32 %v156_v40 }
  0xc8   :  { %v252_v43 = vand.u32 2147483647, %v251_v45 }
  0xca   :  { %v255_v48 = vmul.f32 %v254_v46, %v252_v43 }
  0xcc   :  { %v256_v50 = vxor.u32 2147483648, %v255_v48 }
  0xce   :  { %v257_v51 = vsel %vm174_vm0, %v256_v50, %v255_v48  ;;  %vm522_vm0 = vcmask 261120  }
  0xcf   :  { %v260_v55 = vsel %vm173_vm1, %v696_v20, %v257_v51  ;;  %vm525_vm1 = vcmask 523264  }
  0xd0   :  { %v593_v54 = vpop.eup %592  ;;  %596 = vcosq.f32 %v260_v55 }
  0xd1   :  { %v595_v56 = vpop.eup %594  ;;  %v168_v33 = vxor.u32 2147483648, %v593_v54  ;;  %598 = vsinq.f32 %v260_v55 }
  0xd2   :  { %v165_v58 = vxor.u32 2147483648, %v595_v56 }
  0xd3   :  { %v169_v59 = vsel %vm167_vm3, %v168_v33, %v595_v56  ;;  %v385_v60 = vsel %vm383_vm2, %v168_v33, %v595_v56  ;;  %vm528_vm2 = vcmask 785408  }
  0xd4   :  { %v166_v61 = vsel %vm164_vm4, %v593_v54, %v165_v58  ;;  %v382_v62 = vsel %vm380_vm5, %v593_v54, %v165_v58 }
  0xd5   :  { %v170_v0 = vsel %vm163_vm6, %v166_v61, %v169_v59  ;;  %v386_v1 = vsel %vm379_vm7, %v382_v62, %v385_v60 }
  0xd6   :  { %v171_v3 = vsel %vm160_vm8, nan, %v170_v0  ;;  %v387_v4 = vsel %vm160_vm8, nan, %v386_v1 }
  0xd7   :  { %v283_v5 = vmul.f32 %v559_v26, %v171_v3  ;;  %v498_v6 = vmul.f32 %v568_v63, %v387_v4 }
  0xd9   :  { %v500_v7 = vadd.f32 %v498_v6, %v283_v5 }
  0xda   :  { %v597_v13 = vpop.eup %596 }
  0xdb   :  { %504 = vrot.lane.b32.xlu0 %v500_v7, %s631_s2  ;;  %v599_v15 = vpop.eup %598  ;;  %v272_v16 = vxor.u32 2147483648, %v597_v13 }
  0xdc   :  { %v269_v17 = vxor.u32 2147483648, %v599_v15 }
  0xdd   :  { %v273_v11 = vsel %vm271_vm9, %v272_v16, %v599_v15  ;;  %v488_v18 = vsel %vm486_vm10, %v272_v16, %v599_v15 }
  0xde   :  { %v270_v19 = vsel %vm268_vm11, %v597_v13, %v269_v17  ;;  %v485_v21 = vsel %vm483_vm12, %v597_v13, %v269_v17 }
  0xdf   :  { %510 = vrot.lane.b32.xlu0 %v500_v7, %s632_s3  ;;  %v274_v22 = vsel %vm267_vm13, %v270_v19, %v273_v11  ;;  %v489_v23 = vsel %vm482_vm14, %v485_v21, %v488_v18 }
  0xe0   :  { %v275_v24 = vsel %vm264_vm15, nan, %v274_v22  ;;  %v490_v25 = vsel %vm264_vm15, nan, %v489_v23 }
  0xe1   :  { %v284_v27 = vmul.f32 %v559_v26, %v275_v24  ;;  %v499_v28 = vmul.f32 %v568_v63, %v490_v25 }
  0xe3   :  { %516 = vrot.lane.b32.xlu0 %v500_v7, %s633_s9  ;;  %v501_v29 = vadd.f32 %v499_v28, %v284_v27 }
  0xe5   :  { %506 = vrot.lane.b32.xlu1 %v501_v29, %s631_s2 }
  0xe9   :  { %512 = vrot.lane.b32.xlu1 %v501_v29, %s632_s3 }
  0xed   :  { %518 = vrot.lane.b32.xlu1 %v501_v29, %s633_s9 }
 0x14d   :  { %v505_v30 = vpop.permute.xlu0 %504 }
 0x14e   :  { %v523_v9 = vsel %vm522_vm0, %v500_v7, %v505_v30 }
 0x151   :  { %v511_v32 = vpop.permute.xlu0 %510 }
 0x152   :  { %v526_v10 = vsel %vm525_vm1, %v523_v9, %v511_v32 }
 0x155   :  { %v517_v20 = vpop.permute.xlu0 %516 }
 0x156   :  { %v529_v34 = vsel %vm528_vm2, %v526_v10, %v517_v20 }
 0x157   :  { %531 = vst [vmem:[#allocation2] sm:$0xff] %v529_v34  ;;  %v507_v35 = vpop.permute.xlu1 %506 }
 0x158   :  { %v524_v36 = vsel %vm522_vm0, %v501_v29, %v507_v35 }
 0x15b   :  { %v513_v31 = vpop.permute.xlu1 %512 }
 0x15c   :  { %v527_v37 = vsel %vm525_vm1, %v524_v36, %v513_v31 }
 0x15f   :  { %v519_v38 = vpop.permute.xlu1 %518 }
 0x160   :  { %v530_v39 = vsel %vm528_vm2, %v527_v37, %v519_v38 }
 0x161   :  { %532 = vst [vmem:[#allocation2 + $0x8] sm:$0xff] %v530_v39 }
 0x162   :  { %611 = shalt.err (!%p608_p4)
}
 0x163   :  { %s612_s15 = scalar_lea.hbm %s774_s6, 256 }
 0x164   :  { %p613_p5 = scmp.ne.s32.totalorder %s774_s6, %s612_s15  ;;  %p616_p6 = scmp.lt.u32.totalorder %s612_s15, %s774_s6 }
 0x166   :  { %p618_p7 = pnand %p616_p6, %p613_p5 }
 0x168   :  { %621 = shalt.err (!%p618_p7)
}
 0x169   :  { %s635_s20 = smov 128   ;;  %s636_s21 = smov 8  }
 0x16a   :  { %544 = dma.vmem_to_hbm [thread:$0]  %s539_s11, 256, %s774_s6, [#allocation3], %s635_s20, %s635_s20, %s636_s21  }
 0x16b   :  { %622 = dma.done.wait [#allocation3], 256  }
 0x16c   :  { %623 = vsyncadd [#allocation3], 4294967040 }
 0x16d   :  { %548 = vsyncpa [#allocation3], 1 }

</bundles_post_ra>
